<compile_context>
chip_gen: v5e
topology: v5e:2x2
jax: 0.10.0
libtpu: 0.0.40
codegen_flags: <defaults>
</compile_context>

<pallas_src>
import jax
import jax.numpy as jnp
from jax.experimental import pallas as pl
from jax.experimental.pallas import tpu as pltpu


# Below this many elements, pallas_call launch + per-step overhead dwarfs the
# work for a memory-bound ReLU; let XLA fuse it instead.
# TODO(synk): tune per generation (crossover is higher on v7x's 3.2 TB/s HBM).
_MIN_PALLAS_ELEMS = 1 << 20            # ~4 MiB of f32

_LANE_CANDIDATES = (1024, 512, 256, 128)   # widest lane-dense slab first
_TARGET_BLOCK_BYTES = 8 * 1024 * 1024      # ~8 MiB/block; x4 (in+out, 2-deep
                                           # pipeline) ~= 32 MiB VMEM budget
_VMEM_LIMIT_BYTES = 48 << 20               # explicit scoped-VMEM limit with
                                           # headroom (< 64 MiB v7x physical)
_MIN_GRID_STEPS = 4                        # keep megacore sharding + overlap


def _relu_kernel(x_ref, o_ref):
    # Elementwise ReLU on one VMEM tile (VPU). Weak-typed 0 preserves dtype.
    o_ref[...] = jnp.maximum(x_ref[...], 0)


def _pick_tile_rows(rows, lanes, itemsize):
    """Choose a sublane-aligned, VMEM-friendly row-tile that keeps the grid
    split and (when possible) divides `rows` exactly (no masked tail)."""
    # Sub-32-bit dtypes pack along sublanes: 8 rows for f32, 16 bf16, 32 int8.
    pack = max(8, 32 // itemsize)

    target_rows = max(pack, _TARGET_BLOCK_BYTES // (lanes * itemsize))
    # Keep >= _MIN_GRID_STEPS grid steps so the "parallel" row axis still
    # shards across both v7x TensorCores and DMA/compute overlap is possible.
    if rows >= _MIN_GRID_STEPS * pack:
        target_rows = min(target_rows, rows // _MIN_GRID_STEPS)

    if target_rows >= rows:
        return rows                     # single block == full rows dim (valid)

    target_rows = max(pack, (target_rows // pack) * pack)

    # Prefer the largest divisor of rows that is <= target and pack-aligned,
    # so every store stays unmasked. Fall back to a masked tail if none.
    cand = target_rows
    while cand >= pack:
        if rows % cand == 0:
            return cand
        cand -= pack
    return target_rows


def _relu_pallas_2d(x2d):
    """ReLU over a lane-dense (rows, lanes) slab with a 1-D row grid."""
    rows, lanes = x2d.shape
    itemsize = jnp.dtype(x2d.dtype).itemsize

    tile_rows = _pick_tile_rows(rows, lanes, itemsize)
    grid = (pl.cdiv(rows, tile_rows),)

    return pl.pallas_call(
        _relu_kernel,
        out_shape=jax.ShapeDtypeStruct((rows, lanes), x2d.dtype),
        grid_spec=pltpu.PrefetchScalarGridSpec(
            num_scalar_prefetch=0,
            grid=grid,
            in_specs=[pl.BlockSpec((tile_rows, lanes), lambda i: (i, 0))],
            out_specs=pl.BlockSpec((tile_rows, lanes), lambda i: (i, 0)),
        ),
        # Embarrassingly parallel over rows -> shard across both TCs on v7x;
        # neutral on single-TC v5e/v6e.
        compiler_params=pltpu.CompilerParams(
            dimension_semantics=("parallel",),
            vmem_limit_bytes=_VMEM_LIMIT_BYTES,
        ),
        # Advisory: lets XLA's scheduler treat this custom call as the
        # bandwidth-bound streaming op it is.
        cost_estimate=pl.CostEstimate(
            flops=rows * lanes,
            bytes_accessed=2 * rows * lanes * itemsize,
            transcendentals=0,
        ),
    )(x2d)


def tiny_net_forward(x, *, min_pallas_elems=_MIN_PALLAS_ELEMS):
    """TinyNet forward: relu(x).view(-1). PCSample.apply(x,1,1,0) is identity."""
    total = x.size

    # Tiny inputs: a fused XLA elementwise op is strictly faster than a
    # custom-call round trip at this size on every TPU generation.
    if total < min_pallas_elems:
        return jnp.maximum(x, 0).reshape(-1)

    # Pick the widest lane width that divides the flat size exactly so we
    # never materialize a padded copy (pad + tail-slice would each add a full
    # extra HBM pass around a bandwidth-bound op).
    lanes = next((w for w in _LANE_CANDIDATES if total % w == 0), None)
    if lanes is None:
        # Ragged size with no clean 128-multiple factorization: let XLA fuse.
        return jnp.maximum(x, 0).reshape(-1)

    rows = total // lanes
    x2d = x.reshape(rows, lanes)       # layout plumbing only; data already flat
    out2d = _relu_pallas_2d(x2d)

    # PCSample.apply(x, 1, 1, 0) is an identity on the tensor input.
    return out2d.reshape(-1)           # x.view(-1)


if __name__ == "__main__":
    key = jax.random.PRNGKey(0)
    # Small NCHW conv-style input, consistent with the module.
    x = jax.random.normal(key, (2, 4, 16, 16), dtype=jnp.float32)

    # Reference computed BEFORE any kernel call (pure JAX).
    y_ref = jnp.maximum(x, 0.0).reshape(-1)

    # 1) Normal dispatch: this tiny input takes the fused-XLA fast path.
    y_fast = jax.block_until_ready(tiny_net_forward(x))

    # 2) Force the Pallas kernel path so the kernel itself is exercised
    #    (2048 elems -> (2, 1024) slab, single full block).
    y_kernel = jax.block_until_ready(tiny_net_forward(x, min_pallas_elems=0))

    # 3) Also exercise a multi-step grid (larger slab, exact divisor tiling).
    x_big = jax.random.normal(jax.random.PRNGKey(1), (4, 8, 256, 256),
                              dtype=jnp.float32)           # 2M elems
    y_big_ref = jnp.maximum(x_big, 0.0).reshape(-1)
    y_big = jax.block_until_ready(tiny_net_forward(x_big, min_pallas_elems=0))

    assert y_fast.shape == y_ref.shape, (y_fast.shape, y_ref.shape)
    assert y_kernel.shape == y_ref.shape, (y_kernel.shape, y_ref.shape)
    assert y_big.shape == y_big_ref.shape, (y_big.shape, y_big_ref.shape)
    assert jnp.allclose(y_fast, y_ref), "fast path mismatch vs reference"
    assert jnp.allclose(y_kernel, y_ref), "kernel path mismatch vs reference"
    assert jnp.allclose(y_big, y_big_ref), "multi-block path mismatch vs reference"

    print("KERNEL_OK")
</pallas_src>

<mosaic_0001>
module attributes {stable_mosaic.version = 11 : i64} {
  func.func @_relu_kernel(%arg0: i32, %arg1: memref<2x1024xf32, #tpu.memory_space<vmem>>, %arg2: memref<2x1024xf32, #tpu.memory_space<vmem>>) attributes {dimension_semantics = [#tpu.dimension_semantics<parallel>], iteration_bounds = array<i64: 1>, scalar_prefetch = 0 : i64, scratch_operands = 0 : i64, tpu.core_type = #tpu.core_type<tc>, window_params = [{transform_indices = @transform_0, window_bounds = array<i64: 2, 1024>}, {transform_indices = @transform_1, window_bounds = array<i64: 2, 1024>}]} {
    %c0 = arith.constant 0 : index
    %c0_0 = arith.constant 0 : index
    %0 = vector.load %arg1[%c0, %c0_0] : memref<2x1024xf32, #tpu.memory_space<vmem>>, vector<2x1024xf32>
    %cst = arith.constant 0.000000e+00 : f32
    %1 = vector.broadcast %cst : f32 to vector<2x1024xf32>
    %2 = arith.maximumf %0, %1 : vector<2x1024xf32>
    %c0_1 = arith.constant 0 : index
    %c0_2 = arith.constant 0 : index
    %3 = vector.load %arg2[%c0_1, %c0_2] : memref<2x1024xf32, #tpu.memory_space<vmem>>, vector<2x1024xf32>
    tpu.vector_store %arg2[%c0_1, %c0_2], %2 {strides = array<i32>} : memref<2x1024xf32, #tpu.memory_space<vmem>>, vector<2x1024xf32>,
    return
  }
  func.func @transform_0(%arg0: i32) -> (i32, i32) {
    %c0_i32 = arith.constant 0 : i32
    %c0_i32_0 = arith.constant 0 : i32
    return %arg0, %c0_i32 : i32, i32
  }
  func.func @transform_1(%arg0: i32) -> (i32, i32) {
    %c0_i32 = arith.constant 0 : i32
    %c0_i32_0 = arith.constant 0 : i32
    return %arg0, %c0_i32 : i32, i32
  }
}

</mosaic_0001>

<bundles_post_ra>
// kernel: tpu_custom_call.1
= control target key start
LH: loop header
LB: loop body
LE: loop exit
PB: predicated region body
PF: predicated region fallthrough
CT: control target
= control target key end

     0   :  { %6 = vsyncpa [#allocation3], 0  ;;  %s118_s0 = inlined_call_operand.hbm [shape: f32[2,1024], index: 0, kind: input, shape index: {}]   ;;  %s119_s1 = inlined_call_operand.hbm [shape: f32[2,1024], index: 1, kind: output, shape index: {}]  }
   0x1   :  { %7 = vsyncpa [#allocation4], 0  ;;  %s13_s8 = sshll.u32 %s118_s0, 4  ;;  %s100_s9 = smov [#allocation2]   ;;  %s14_s8 = int_to_ptr.hbm [resolvable:$true] %s13_s8 }
   0x2   :  { %s15_s10 = sshll.u32 %s100_s9, 4  ;;  %s16_s10 = int_to_ptr.vmem [resolvable:$true] %s15_s10 }
   0x3   :  { %18 = dma.hbm_to_vmem [thread:$0]  %s14_s8, 256, %s16_s10, [#allocation3]  }
   0x4   :  { %96 = dma.done.wait [#allocation3], 256  }
   0x5   :  { %97 = vsyncadd [#allocation3], 4294967040  ;;  %s101_s11 = smov [#allocation5]   ;;  %s36_s15 = sshll.u32 %s119_s1, 4  ;;  %v23_v0 = vld [vmem:[#allocation2] sm:$0xff]  ;;  %v24_v1 = vld [vmem:[#allocation2 + $0x8] sm:$0xff]  ;;  %s37_s15 = int_to_ptr.hbm [resolvable:$true] %s36_s15 }
   0x6   :  { %s34_s12 = sshll.u32 %s101_s11, 4  ;;  %v25_v2 = vmax.f32 %v23_v0, 0.0  ;;  %v26_v3 = vmax.f32 %v24_v1, 0.0  ;;  %s35_s12 = int_to_ptr.vmem [resolvable:$true] %s34_s12 }
   0x8   :  { %27 = vst [vmem:[#allocation5] sm:$0xff] %v25_v2 }
   0x9   :  { %28 = vst [vmem:[#allocation5 + $0x8] sm:$0xff] %v26_v3 }
   0xa   :  { %39 = dma.vmem_to_hbm [thread:$0]  %s35_s12, 256, %s37_s15, [#allocation4]  }
   0xb   :  { %98 = dma.done.wait [#allocation4], 256  }
   0xc   :  { %99 = vsyncadd [#allocation4], 4294967040 }
   0xd   :  { %44 = vsyncpa [#allocation3], 1 }
   0xe   :  { %45 = vsyncpa [#allocation4], 1 }

</bundles_post_ra>
